<compile_context>
chip_gen: v7x
topology: tpu7x:2x2x1
jax: 0.10.0
libtpu: 0.0.40
codegen_flags: <defaults>
</compile_context>

<pallas_src>
import jax
import jax.numpy as jnp
import numpy as np
from jax.experimental import pallas as pl
from jax.experimental.pallas import tpu as pltpu

# Problem sizes (small, consistent with the module's forward)
N_NODES = 16        # total nodes across the batch of graphs
F_IN = 8            # in_channels of node features
HIDDEN = 32         # hidden_dims[i] (uniform)
N_LAYERS = 2        # architecture.num_layers
N_EDGES = 32        # total edges
N_GRAPHS = 2        # number of graphs in the Batch
OUT_CH = 4          # GraphNet out_channels


def _align8(n):
    return (n + 7) // 8 * 8


G_PAD = _align8(N_GRAPHS)       # pool/output rows padded to a sublane tile

# ---- row layout of the single packed [TOTAL_ROWS, HIDDEN] bf16 buffer -------
# Every slot is 8-row aligned; weight slots are HIDDEN rows, bias slots 8 rows.
OFF_X = 0                        # [HIDDEN, HIDDEN]  node features (real [N, F_IN])
OFF_ADJ = OFF_X + HIDDEN         # [HIDDEN, HIDDEN]  adjacency counts (real [N, N])
OFF_POOL = OFF_ADJ + HIDDEN      # [G_PAD, HIDDEN]   normalized pool (real [G, N])
OFF_LAYERS = OFF_POOL + G_PAD


def _build_layout():
    offs = []
    cur = OFF_LAYERS
    for l in range(N_LAYERS):
        d = {}
        d["w_msg_a"] = cur; cur += HIDDEN
        d["b_msg_a"] = cur; cur += 8
        d["w_up1_h"] = cur; cur += HIDDEN
        d["b_up1"] = cur; cur += 8
        if l < N_LAYERS - 1:            # last layer's w_up2 is folded into the head
            d["w_up2"] = cur; cur += HIDDEN
            d["b_up2"] = cur; cur += 8
        offs.append(d)
    head = {"w_head": cur, "b_head": cur + HIDDEN}
    cur += HIDDEN + 8
    return offs, head, cur


LAYER_OFFS, HEAD_OFFS, TOTAL_ROWS = _build_layout()


# ------------------------------- kernel --------------------------------------
def graphnet_kernel(buf_ref, out_ref):
    H = HIDDEN
    f32 = jnp.float32
    bf16 = jnp.bfloat16

    x = buf_ref[OFF_X:OFF_X + H, :]                  # [H, H]; real [N, F_IN], rest 0
    adj = buf_ref[OFF_ADJ:OFF_ADJ + H, :]            # [H, H]; real [N, N], rest 0
    pool = buf_ref[OFF_POOL:OFF_POOL + G_PAD, :]     # [G_PAD, H]; real [G, N], rest 0

    h = x
    u1 = None
    for l in range(N_LAYERS):
        o = LAYER_OFFS[l]
        w_msg_a = buf_ref[o["w_msg_a"]:o["w_msg_a"] + H, :]
        b_msg_a = buf_ref[o["b_msg_a"]:o["b_msg_a"] + 1, :]
        w_up1_h = buf_ref[o["w_up1_h"]:o["w_up1_h"] + H, :]
        b_up1 = buf_ref[o["b_up1"]:o["b_up1"] + 1, :]

        # t = h @ (w_msg @ w_up1_a) + (b_msg @ w_up1_a)   (message folded through
        # the aggregation-side update weight; layer 0 also has W_in/b_in folded in)
        t = jnp.dot(h, w_msg_a, preferred_element_type=f32) + b_msg_a
        # u1 = relu(h @ w_up1_h + adj @ t + b_up1) ; adj@t == aggr @ w_up1_a
        u1 = jnp.maximum(
            jnp.dot(h, w_up1_h, preferred_element_type=f32)
            + jnp.dot(adj, t.astype(bf16), preferred_element_type=f32)
            + b_up1,
            0.0)
        if l < N_LAYERS - 1:
            w_up2 = buf_ref[o["w_up2"]:o["w_up2"] + H, :]
            b_up2 = buf_ref[o["b_up2"]:o["b_up2"] + 1, :]
            h = (jnp.dot(u1.astype(bf16), w_up2, preferred_element_type=f32)
                 + b_up2).astype(bf16)
        # F.dropout(p=0.1): eval-mode -> identity (deterministic kernel)

    # mean pool (normalization pre-folded into `pool`) + output head with the
    # last layer's w_up2 folded in:  out = (pool@u1) @ (w_up2@w_out) + (b_up2@w_out + b_out)
    w_head = buf_ref[HEAD_OFFS["w_head"]:HEAD_OFFS["w_head"] + H, :]
    b_head = buf_ref[HEAD_OFFS["b_head"]:HEAD_OFFS["b_head"] + 1, :]
    pooled = jnp.dot(pool, u1.astype(bf16), preferred_element_type=f32)
    out_ref[...] = (jnp.dot(pooled.astype(bf16), w_head, preferred_element_type=f32)
                    + b_head)


# ------------------------------ wrapper ---------------------------------------
def pack_inputs(x, edge_index, batch, params):
    """Pack features + topology + all (algebraically folded) weights into ONE
    bf16 [TOTAL_ROWS, HIDDEN] buffer -> a single input DMA."""
    H = HIDDEN
    f32 = jnp.float32

    # --- topology preprocessing (pure JAX, hoisted out of the kernel) ---
    src, dst = edge_index[0], edge_index[1]
    gather = jax.nn.one_hot(src, N_NODES, dtype=f32)       # [E, N]
    scatter = jax.nn.one_hot(dst, N_NODES, dtype=f32)      # [E, N]
    adj = scatter.T @ gather                                # [N, N] edge counts m->n
    pool = jax.nn.one_hot(batch, N_GRAPHS, dtype=f32).T     # [G, N]
    counts = jnp.maximum(pool.sum(-1, keepdims=True), 1.0)  # empty-graph guard
    pool_norm = pool / counts                                # mean-pool weights

    buf = jnp.zeros((TOTAL_ROWS, H), f32)
    buf = buf.at[OFF_X:OFF_X + N_NODES, :F_IN].set(x)
    buf = buf.at[OFF_ADJ:OFF_ADJ + N_NODES, :N_NODES].set(adj)
    buf = buf.at[OFF_POOL:OFF_POOL + N_GRAPHS, :N_NODES].set(pool_norm)

    w_in, b_in = params["w_in"], params["b_in"]              # [F,H], [1,H]

    for l in range(N_LAYERS):
        o = LAYER_OFFS[l]
        w_msg, b_msg = params["w_msg"][l], params["b_msg"][l]      # [H,H], [1,H]
        w_up1, b_up1 = params["w_up1"][l], params["b_up1"][l]      # [2H,H], [1,H]
        w_up1_h, w_up1_a = w_up1[:H], w_up1[H:]

        # fold the message Linear through the aggregation-side update weight
        w_msg_a = w_msg @ w_up1_a                                  # [H,H]
        b_msg_a = b_msg @ w_up1_a                                  # [1,H]

        if l == 0:
            # fold the input projection into layer 0's two h-side matmuls
            w_msg_a_eff = w_in @ w_msg_a                           # [F,H]
            b_msg_a_eff = b_in @ w_msg_a + b_msg_a
            w_up1_h_eff = w_in @ w_up1_h                           # [F,H]
            b_up1_eff = b_up1 + b_in @ w_up1_h
            rows = F_IN
        else:
            w_msg_a_eff, b_msg_a_eff = w_msg_a, b_msg_a
            w_up1_h_eff, b_up1_eff = w_up1_h, b_up1
            rows = H

        buf = buf.at[o["w_msg_a"]:o["w_msg_a"] + rows, :].set(w_msg_a_eff)
        buf = buf.at[o["b_msg_a"]:o["b_msg_a"] + 1, :].set(b_msg_a_eff)
        buf = buf.at[o["w_up1_h"]:o["w_up1_h"] + rows, :].set(w_up1_h_eff)
        buf = buf.at[o["b_up1"]:o["b_up1"] + 1, :].set(b_up1_eff)
        if l < N_LAYERS - 1:
            buf = buf.at[o["w_up2"]:o["w_up2"] + H, :].set(params["w_up2"][l])
            buf = buf.at[o["b_up2"]:o["b_up2"] + 1, :].set(params["b_up2"][l])

    # head: fold last layer's w_up2 with the (zero-padded) output projection;
    # mean-pool rows sum to 1, so b_up2 commutes through the pooling matmul.
    w_up2_L = params["w_up2"][N_LAYERS - 1]
    b_up2_L = params["b_up2"][N_LAYERS - 1]
    w_out_pad = jnp.zeros((H, H), f32).at[:, :OUT_CH].set(params["w_out"])
    b_out_pad = jnp.zeros((1, H), f32).at[:, :OUT_CH].set(params["b_out"])
    w_head = w_up2_L @ w_out_pad
    b_head = b_up2_L @ w_out_pad + b_out_pad
    buf = buf.at[HEAD_OFFS["w_head"]:HEAD_OFFS["w_head"] + H, :].set(w_head)
    buf = buf.at[HEAD_OFFS["b_head"]:HEAD_OFFS["b_head"] + 1, :].set(b_head)

    return buf.astype(jnp.bfloat16)


def graphnet_forward(x, edge_index, batch, params):
    """Single-invocation Pallas kernel: ONE input DMA, everything VMEM-resident."""
    buf = pack_inputs(x, edge_index, batch, params)
    vmem = pl.BlockSpec(memory_space=pltpu.MemorySpace.VMEM)
    out_full = pl.pallas_call(
        graphnet_kernel,
        out_shape=jax.ShapeDtypeStruct((G_PAD, HIDDEN), jnp.float32),
        in_specs=[vmem],
        out_specs=vmem,
    )(buf)
    return out_full[:N_GRAPHS, :OUT_CH]


# ----------------------------- reference --------------------------------------
def reference_forward(x, edge_index, batch, params):
    """Pure-JAX f32 reference (unfused gather / segment_sum form)."""
    h = x @ params["w_in"] + params["b_in"][0]
    src, dst = edge_index[0], edge_index[1]
    for l in range(N_LAYERS):
        m = h[src] @ params["w_msg"][l] + params["b_msg"][l, 0]
        aggr = jax.ops.segment_sum(m, dst, num_segments=N_NODES)
        cat = jnp.concatenate([h, aggr], axis=-1)
        u1 = jax.nn.relu(cat @ params["w_up1"][l] + params["b_up1"][l, 0])
        h = u1 @ params["w_up2"][l] + params["b_up2"][l, 0]
    pool = jax.nn.one_hot(batch, N_GRAPHS, dtype=jnp.float32)     # [N, G]
    pooled = (pool.T @ h) / pool.sum(0)[:, None]
    return pooled @ params["w_out"] + params["b_out"][0]


def init_params(key):
    """Deterministic parameter init (uniform +-1/sqrt(fan_in), like nn.Linear)."""
    def linear(k, fan_in, shape):
        bound = 1.0 / np.sqrt(fan_in)
        return jax.random.uniform(k, shape, jnp.float32, -bound, bound)

    ks = jax.random.split(key, 12)
    H, L = HIDDEN, N_LAYERS
    return {
        "w_in":  linear(ks[0], F_IN, (F_IN, H)),
        "b_in":  linear(ks[1], F_IN, (1, H)),
        "w_msg": linear(ks[2], H, (L, H, H)),
        "b_msg": linear(ks[3], H, (L, 1, H)),
        "w_up1": linear(ks[4], 2 * H, (L, 2 * H, H)),
        "b_up1": linear(ks[5], 2 * H, (L, 1, H)),
        "w_up2": linear(ks[6], H, (L, H, H)),
        "b_up2": linear(ks[7], H, (L, 1, H)),
        "w_out": linear(ks[8], H, (H, OUT_CH)),
        "b_out": linear(ks[9], H, (1, OUT_CH)),
    }


if __name__ == "__main__":
    key = jax.random.PRNGKey(0)
    k_x, k_e1, k_e2, k_p = jax.random.split(key, 4)

    # Node features [N, F_in]
    x = jax.random.normal(k_x, (N_NODES, F_IN), dtype=jnp.float32)

    # Batched graph: graph 0 owns nodes 0..7, graph 1 owns nodes 8..15; 16 edges each.
    nodes_per_graph = N_NODES // N_GRAPHS
    edges_per_graph = N_EDGES // N_GRAPHS
    src0 = jax.random.randint(k_e1, (edges_per_graph,), 0, nodes_per_graph)
    dst0 = jax.random.randint(k_e2, (edges_per_graph,), 0, nodes_per_graph)
    src = jnp.concatenate([src0, src0 + nodes_per_graph]).astype(jnp.int32)
    dst = jnp.concatenate([dst0, dst0 + nodes_per_graph]).astype(jnp.int32)
    edge_index = jnp.stack([src, dst], axis=0)                           # [2, E]
    batch = jnp.repeat(jnp.arange(N_GRAPHS, dtype=jnp.int32), nodes_per_graph)  # [N]

    params = init_params(k_p)

    out = graphnet_forward(x, edge_index, batch, params)
    out = jax.block_until_ready(out)

    ref = reference_forward(x, edge_index, batch, params)
    # bf16 MXU operands (f32 accumulation) -> loosened tolerance vs. the f32 reference.
    np.testing.assert_allclose(np.asarray(out), np.asarray(ref), rtol=3e-2, atol=3e-2)

    print("KERNEL_OK")
</pallas_src>

<mosaic_0001>
module attributes {stable_mosaic.version = 11 : i64} {
  func.func @graphnet_kernel(%arg0: memref<312x32xbf16, #tpu.memory_space<vmem>>, %arg1: memref<8x32xf32, #tpu.memory_space<vmem>>) attributes {dimension_semantics = [], scalar_prefetch = 0 : i64, scratch_operands = 0 : i64, tpu.core_type = #tpu.core_type<tc>} {
    %c0 = arith.constant 0 : index
    %c0_0 = arith.constant 0 : index
    %0 = vector.load %arg0[%c0, %c0_0] : memref<312x32xbf16, #tpu.memory_space<vmem>>, vector<32x32xbf16>
    %c32 = arith.constant 32 : index
    %c0_1 = arith.constant 0 : index
    %1 = vector.load %arg0[%c32, %c0_1] : memref<312x32xbf16, #tpu.memory_space<vmem>>, vector<32x32xbf16>
    %c64 = arith.constant 64 : index
    %c0_2 = arith.constant 0 : index
    %2 = vector.load %arg0[%c64, %c0_2] : memref<312x32xbf16, #tpu.memory_space<vmem>>, vector<8x32xbf16>
    %c72 = arith.constant 72 : index
    %c0_3 = arith.constant 0 : index
    %3 = vector.load %arg0[%c72, %c0_3] : memref<312x32xbf16, #tpu.memory_space<vmem>>, vector<32x32xbf16>
    %c104 = arith.constant 104 : index
    %c0_4 = arith.constant 0 : index
    %4 = vector.load %arg0[%c104, %c0_4] : memref<312x32xbf16, #tpu.memory_space<vmem>>, vector<1x32xbf16>
    %c112 = arith.constant 112 : index
    %c0_5 = arith.constant 0 : index
    %5 = vector.load %arg0[%c112, %c0_5] : memref<312x32xbf16, #tpu.memory_space<vmem>>, vector<32x32xbf16>
    %c144 = arith.constant 144 : index
    %c0_6 = arith.constant 0 : index
    %6 = vector.load %arg0[%c144, %c0_6] : memref<312x32xbf16, #tpu.memory_space<vmem>>, vector<1x32xbf16>
    %cst = arith.constant dense<0.000000e+00> : vector<32x32xf32>
    %7 = tpu.matmul %0, %3, %cst {dimension_numbers = #tpu.dot_dimension_numbers<[1], [0], [0], [1], [0, 0, 1, 1], [], []>} : vector<32x32xbf16>, vector<32x32xbf16>, vector<32x32xf32> -> vector<32x32xf32>
    %8 = arith.extf %4 : vector<1x32xbf16> to vector<1x32xf32>
    %9 = vector.broadcast %8 : vector<1x32xf32> to vector<32x32xf32>
    %10 = arith.addf %7, %9 : vector<32x32xf32>
    %cst_7 = arith.constant dense<0.000000e+00> : vector<32x32xf32>
    %11 = tpu.matmul %0, %5, %cst_7 {dimension_numbers = #tpu.dot_dimension_numbers<[1], [0], [0], [1], [0, 0, 1, 1], [], []>} : vector<32x32xbf16>, vector<32x32xbf16>, vector<32x32xf32> -> vector<32x32xf32>
    %12 = arith.truncf %10 : vector<32x32xf32> to vector<32x32xbf16>
    %cst_8 = arith.constant dense<0.000000e+00> : vector<32x32xf32>
    %13 = tpu.matmul %1, %12, %cst_8 {dimension_numbers = #tpu.dot_dimension_numbers<[1], [0], [0], [1], [0, 0, 1, 1], [], []>} : vector<32x32xbf16>, vector<32x32xbf16>, vector<32x32xf32> -> vector<32x32xf32>
    %14 = arith.addf %11, %13 : vector<32x32xf32>
    %15 = arith.extf %6 : vector<1x32xbf16> to vector<1x32xf32>
    %16 = vector.broadcast %15 : vector<1x32xf32> to vector<32x32xf32>
    %17 = arith.addf %14, %16 : vector<32x32xf32>
    %cst_9 = arith.constant 0.000000e+00 : f32
    %18 = vector.broadcast %cst_9 : f32 to vector<32x32xf32>
    %19 = arith.maximumf %17, %18 : vector<32x32xf32>
    %c152 = arith.constant 152 : index
    %c0_10 = arith.constant 0 : index
    %20 = vector.load %arg0[%c152, %c0_10] : memref<312x32xbf16, #tpu.memory_space<vmem>>, vector<32x32xbf16>
    %c184 = arith.constant 184 : index
    %c0_11 = arith.constant 0 : index
    %21 = vector.load %arg0[%c184, %c0_11] : memref<312x32xbf16, #tpu.memory_space<vmem>>, vector<1x32xbf16>
    %22 = arith.truncf %19 : vector<32x32xf32> to vector<32x32xbf16>
    %cst_12 = arith.constant dense<0.000000e+00> : vector<32x32xf32>
    %23 = tpu.matmul %22, %20, %cst_12 {dimension_numbers = #tpu.dot_dimension_numbers<[1], [0], [0], [1], [0, 0, 1, 1], [], []>} : vector<32x32xbf16>, vector<32x32xbf16>, vector<32x32xf32> -> vector<32x32xf32>
    %24 = arith.extf %21 : vector<1x32xbf16> to vector<1x32xf32>
    %25 = vector.broadcast %24 : vector<1x32xf32> to vector<32x32xf32>
    %26 = arith.addf %23, %25 : vector<32x32xf32>
    %27 = arith.truncf %26 : vector<32x32xf32> to vector<32x32xbf16>
    %c192 = arith.constant 192 : index
    %c0_13 = arith.constant 0 : index
    %28 = vector.load %arg0[%c192, %c0_13] : memref<312x32xbf16, #tpu.memory_space<vmem>>, vector<32x32xbf16>
    %c224 = arith.constant 224 : index
    %c0_14 = arith.constant 0 : index
    %29 = vector.load %arg0[%c224, %c0_14] : memref<312x32xbf16, #tpu.memory_space<vmem>>, vector<1x32xbf16>
    %c232 = arith.constant 232 : index
    %c0_15 = arith.constant 0 : index
    %30 = vector.load %arg0[%c232, %c0_15] : memref<312x32xbf16, #tpu.memory_space<vmem>>, vector<32x32xbf16>
    %c264 = arith.constant 264 : index
    %c0_16 = arith.constant 0 : index
    %31 = vector.load %arg0[%c264, %c0_16] : memref<312x32xbf16, #tpu.memory_space<vmem>>, vector<1x32xbf16>
    %cst_17 = arith.constant dense<0.000000e+00> : vector<32x32xf32>
    %32 = tpu.matmul %27, %28, %cst_17 {dimension_numbers = #tpu.dot_dimension_numbers<[1], [0], [0], [1], [0, 0, 1, 1], [], []>} : vector<32x32xbf16>, vector<32x32xbf16>, vector<32x32xf32> -> vector<32x32xf32>
    %33 = arith.extf %29 : vector<1x32xbf16> to vector<1x32xf32>
    %34 = vector.broadcast %33 : vector<1x32xf32> to vector<32x32xf32>
    %35 = arith.addf %32, %34 : vector<32x32xf32>
    %cst_18 = arith.constant dense<0.000000e+00> : vector<32x32xf32>
    %36 = tpu.matmul %27, %30, %cst_18 {dimension_numbers = #tpu.dot_dimension_numbers<[1], [0], [0], [1], [0, 0, 1, 1], [], []>} : vector<32x32xbf16>, vector<32x32xbf16>, vector<32x32xf32> -> vector<32x32xf32>
    %37 = arith.truncf %35 : vector<32x32xf32> to vector<32x32xbf16>
    %cst_19 = arith.constant dense<0.000000e+00> : vector<32x32xf32>
    %38 = tpu.matmul %1, %37, %cst_19 {dimension_numbers = #tpu.dot_dimension_numbers<[1], [0], [0], [1], [0, 0, 1, 1], [], []>} : vector<32x32xbf16>, vector<32x32xbf16>, vector<32x32xf32> -> vector<32x32xf32>
    %39 = arith.addf %36, %38 : vector<32x32xf32>
    %40 = arith.extf %31 : vector<1x32xbf16> to vector<1x32xf32>
    %41 = vector.broadcast %40 : vector<1x32xf32> to vector<32x32xf32>
    %42 = arith.addf %39, %41 : vector<32x32xf32>
    %cst_20 = arith.constant 0.000000e+00 : f32
    %43 = vector.broadcast %cst_20 : f32 to vector<32x32xf32>
    %44 = arith.maximumf %42, %43 : vector<32x32xf32>
    %c272 = arith.constant 272 : index
    %c0_21 = arith.constant 0 : index
    %45 = vector.load %arg0[%c272, %c0_21] : memref<312x32xbf16, #tpu.memory_space<vmem>>, vector<32x32xbf16>
    %c304 = arith.constant 304 : index
    %c0_22 = arith.constant 0 : index
    %46 = vector.load %arg0[%c304, %c0_22] : memref<312x32xbf16, #tpu.memory_space<vmem>>, vector<1x32xbf16>
    %47 = arith.truncf %44 : vector<32x32xf32> to vector<32x32xbf16>
    %cst_23 = arith.constant dense<0.000000e+00> : vector<8x32xf32>
    %48 = tpu.matmul %2, %47, %cst_23 {dimension_numbers = #tpu.dot_dimension_numbers<[1], [0], [0], [1], [0, 0, 1, 1], [], []>} : vector<8x32xbf16>, vector<32x32xbf16>, vector<8x32xf32> -> vector<8x32xf32>
    %49 = arith.truncf %48 : vector<8x32xf32> to vector<8x32xbf16>
    %cst_24 = arith.constant dense<0.000000e+00> : vector<8x32xf32>
    %50 = tpu.matmul %49, %45, %cst_24 {dimension_numbers = #tpu.dot_dimension_numbers<[1], [0], [0], [1], [0, 0, 1, 1], [], []>} : vector<8x32xbf16>, vector<32x32xbf16>, vector<8x32xf32> -> vector<8x32xf32>
    %51 = arith.extf %46 : vector<1x32xbf16> to vector<1x32xf32>
    %52 = vector.broadcast %51 : vector<1x32xf32> to vector<8x32xf32>
    %53 = arith.addf %50, %52 : vector<8x32xf32>
    %c0_25 = arith.constant 0 : index
    %c0_26 = arith.constant 0 : index
    %54 = vector.load %arg1[%c0_25, %c0_26] : memref<8x32xf32, #tpu.memory_space<vmem>>, vector<8x32xf32>
    tpu.vector_store %arg1[%c0_25, %c0_26], %53 {strides = array<i32>} : memref<8x32xf32, #tpu.memory_space<vmem>>, vector<8x32xf32>,
    return
  }
}

</mosaic_0001>

<bundles_post_ra>
// kernel: tpu_custom_call.1
= control target key start
LH: loop header
LB: loop body
LE: loop exit
PB: predicated region body
PF: predicated region fallthrough
CT: control target
= control target key end

     0   :  { %vm56_vm0 = vcmask 261120   ;;  %s981_s0 = inlined_call_operand.vmem [shape: bf16[312,32], index: 0, kind: input, shape index: {}]   ;;  %s982_s1 = inlined_call_operand.hbm [shape: f32[8,32], index: 1, kind: output, shape index: {}]  }
   0x1   :  { %v816_v0 = vld [vmem:[%s981_s0 + $0x24] sm:$0xff]   ;;  %v817_v1 = vld [vmem:[%s981_s0 + $0x2c] sm:$0xff]  }
   0x2   :  { %733 = vmatprep.subr.bf16.mxu0 %v816_v0  ;;  %v818_v2 = vld [vmem:[%s981_s0] sm:$0xff]   ;;  %v819_v3 = vld [vmem:[%s981_s0 + $0x8] sm:$0xff]  }
   0x3   :  { %734 = vmatpush3.bf16.msra.mxu0 %v816_v0  ;;  %737 = vmatprep.mubr.msk.bf16.mxu0 %vm56_vm0, %v818_v2 }
   0x4   :  { %735 = vmatprep.subr.bf16.mxu0 %v817_v1 }
   0x7   :  { %736 = vmatpush3.bf16.msra.mxu0 %v817_v1 }
   0xa   :  { %738 = vmatmul.mubr.msk.bf16.vlgmr.msra.gmra.mrb[0].mxu0 %vm56_vm0, %v819_v3 }
   0xb   :  { %6 = vsyncpa [#allocation3], 0  ;;  %v820_v4 = vld [vmem:[%s981_s0 + $0x10] sm:$0xff]   ;;  %v30_v5 = vlaneseq  ;;  %v822_v21 = vld [vmem:[%s981_s0 + $0x38] sm:$0xff]   ;;  %vm857_vm1 = vmmov 0   ;;  %s858_s23 = smov [#allocation2]  }
   0xc   :  { %745 = vmatprep.mubr.msk.bf16.mxu1 %vm56_vm0, %v820_v4  ;;  %v23_v7 = vld [vmem:[%s981_s0 + $0x34] sm:$0x1]  ;;  %v899_v22 = vld [vmem:[%s981_s0 + $0x18] sm:$0xff]   ;;  %v823_v23 = vld [vmem:[%s981_s0 + $0x40] sm:$0xff]   ;;  %s659_s24 = sshll.u32 %s858_s23, 4  ;;  %s660_s24 = int_to_ptr.vmem [resolvable:$true] %s659_s24 }
   0xd   :  { %v31_v6 = vshrl.u32 %v30_v5, 7  ;;  %v29_v8 = vunpack.c.l.bf16 %v23_v7  ;;  %v824_v24 = vld [vmem:[%s981_s0 + $0x4c] sm:$0xff]   ;;  %v825_v25 = vld [vmem:[%s981_s0 + $0x54] sm:$0xff]   ;;  %v28_v26 = vld [vmem:[%s981_s0 + $0x48] sm:$0x1]  ;;  %s832_s25 = scalar_lea.vmem %s660_s24, 128  ;;  %p837_p1 = scmp.lt.s32.totalorder %s660_s24, %s660_s24 }
   0xe   :  { %757 = vmatprep.subr.bf16.mxu0 %v824_v24  ;;  %v240_v27 = vunpack.c.l.bf16 %v28_v26  ;;  %v826_v43 = vld [vmem:[%s981_s0 + $0x60] sm:$0xff]   ;;  %v827_v44 = vld [vmem:[%s981_s0 + $0x68] sm:$0xff]   ;;  %v257_v45 = vld [vmem:[%s981_s0 + $0x5c] sm:$0x1]  ;;  %p833_p0 = scmp.ne.s32.totalorder %s660_s24, %s832_s25  ;;  %p838_p2 = scmp.lt.s32.totalorder %s832_s25, %s832_s25 }
   0xf   :  { %v890_v9 = vsub.s32 0, %v31_v6  ;;  %758 = vmatpush3.bf16.msra.mxu0 %v824_v24  ;;  %v260_v46 = vunpack.c.l.bf16 %v257_v45  ;;  %v338_v58 = vld [vmem:[%s981_s0 + $0x70] sm:$0x1]  ;;  %v828_v7 = vld [vmem:[%s981_s0 + $0x74] sm:$0xff]  }
  0x10   :  { %759 = vmatprep.subr.bf16.mxu0 %v825_v25  ;;  %v344_v59 = vunpack.c.l.bf16 %v338_v58  ;;  %p839_p3 = por %p838_p2, %p837_p1 }
  0x11   :  { %v33_v10 = vrot.slane %v29_v8, %v890_v9  ;;  %v244_v28 = vrot.slane %v240_v27, %v890_v9  ;;  %v264_v47 = vrot.slane %v260_v46, %v890_v9  ;;  %v829_v8 = vld [vmem:[%s981_s0 + $0x7c] sm:$0xff]  }
  0x12   :  { %v348_v60 = vrot.slane %v344_v59, %v890_v9  ;;  %p840_p4 = pnand %p839_p3, %p833_p0 }
  0x13   :  { %760 = vmatpush3.bf16.msra.mxu0 %v825_v25 }
  0x14   :  { %765 = vmatprep.subr.bf16.mxu0 %v826_v43 }
  0xdd   :  { %v739_v11 = vpop.f32.mrb[0].mxu0 }
  0xde   :  { %v97_v12 = vpop.f32.mrb[1].mxu0  ;;  %v106_v14 = vadd.f32 %v739_v11, %v33_v10  ;;  %v343_v11 = vld [vmem:[%s981_s0 + $0x84] sm:$0x1] }
  0xdf   :  { %v740_v13 = vpop.f32.mrb[2].mxu0  ;;  %v98_v17 = vadd.f32 %v97_v12, %v33_v10  ;;  %v528_v12 = vunpack.c.l.bf16 %v343_v11 }
  0xe0   :  { %v109_v15 = vadd.f32 %v740_v13, %v33_v10  ;;  %v100_v16 = vpop.f32.mrb[3].mxu0 }
  0xe1   :  { %v101_v18 = vadd.f32 %v100_v16, %v33_v10  ;;  %v856_v10 = vmov 0.0   ;;  %v532_v13 = vrot.slane %v528_v12, %v890_v9 }
  0xe2   :  { %v113_v19 = vpack.c.bf16 %v109_v15, %v106_v14 }
  0xe3   :  { %v112_v20 = vpack.c.bf16 %v101_v18, %v98_v17 }
  0xe5   :  { %741 = vmatprep.subr.bf16.mxu1 %v112_v20 }
  0xe6   :  { %742 = vmatpush3.bf16.msra.mxu1 %v112_v20 }
  0xe7   :  { %743 = vmatprep.subr.bf16.mxu1 %v113_v19 }
  0xea   :  { %744 = vmatpush3.bf16.msra.mxu1 %v113_v19 }
  0xeb   :  { %749 = vmatprep.subr.bf16.mxu1 %v822_v21 }
  0xed   :  { %746 = vmatmul.mubr.msk.bf16.vlgmr.msra.gmra.mrb[0].mxu1 %vm56_vm0, %v899_v22 }
  0xee   :  { %750 = vmatpush3.bf16.msra.mxu1 %v822_v21  ;;  %753 = vmatprep.mubr.msk.bf16.mxu1 %vm56_vm0, %v818_v2 }
  0xef   :  { %751 = vmatprep.subr.bf16.mxu1 %v823_v23 }
  0xf2   :  { %752 = vmatpush3.bf16.msra.mxu1 %v823_v23 }
  0xf9   :  { %754 = vmatmul.mubr.msk.bf16.vlgmr.msra.gmra.mrb[0].mxu1 %vm56_vm0, %v819_v3 }
  0xfa   :  { %777 = vmatprep.mubr.msk.bf16.mxu1 %vm56_vm0, %v820_v4 }
 0x1cc   :  { %v755_v29 = vpop.f32.mrb[0].mxu1 }
 0x1cd   :  { %v247_v30 = vadd.f32 %v755_v29, %v244_v28  ;;  %v225_v31 = vpop.f32.mrb[1].mxu1  ;;  %v830_v29 = vld [vmem:[%s981_s0 + $0x88] sm:$0xff]  }
 0x1ce   :  { %v245_v32 = vadd.f32 %v244_v28, %v225_v31  ;;  %v756_v33 = vpop.f32.mrb[2].mxu1 }
 0x1cf   :  { %v248_v34 = vadd.f32 %v756_v33, %v244_v28  ;;  %v228_v35 = vpop.f32.mrb[3].mxu1  ;;  %v251_v37 = vmax.f32 %v247_v30, 0.0  ;;  %v831_v30 = vld [vmem:[%s981_s0 + $0x90] sm:$0xff]  }
 0x1d0   :  { %v246_v36 = vadd.f32 %v244_v28, %v228_v35  ;;  %v249_v39 = vmax.f32 %v245_v32, 0.0  ;;  %v18_v28 = vld [vmem:[%s981_s0 + $0x20] sm:$0xf] }
 0x1d1   :  { %v252_v38 = vmax.f32 %v248_v34, 0.0 }
 0x1d2   :  { %v250_v40 = vmax.f32 %v246_v36, 0.0  ;;  %v545_v36 = vld [vmem:[%s981_s0 + $0x98] sm:$0x1] }
 0x1d3   :  { %v259_v41 = vpack.c.bf16 %v252_v38, %v251_v37  ;;  %v592_v37 = vunpack.c.l.bf16 %v545_v36 }
 0x1d4   :  { %v258_v42 = vpack.c.bf16 %v250_v40, %v249_v39 }
 0x1d5   :  { %v596_v38 = vrot.slane %v592_v37, %v890_v9 }
 0x1d6   :  { %761 = vmatprep.mubr.msk.bf16.mxu0 %vm56_vm0, %v258_v42 }
 0x1d7   :  { %762 = vmatmul.mubr.msk.bf16.vlgmr.msra.gmra.mrb[4].mxu0 %vm56_vm0, %v259_v41 }
 0x1d8   :  { %766 = vmatpush3.bf16.msra.mxu0 %v826_v43 }
 0x1d9   :  { %767 = vmatprep.subr.bf16.mxu0 %v827_v44 }
 0x1dc   :  { %768 = vmatpush3.bf16.msra.mxu0 %v827_v44 }
 0x1dd   :  { %789 = vmatprep.subr.bf16.mxu0 %v856_v10 }
 0x2aa   :  { %v763_v48 = vpop.f32.mrb[4].mxu0 }
 0x2ab   :  { %v317_v49 = vpop.f32.mrb[5].mxu0  ;;  %v326_v51 = vadd.f32 %v763_v48, %v264_v47 }
 0x2ac   :  { %v764_v50 = vpop.f32.mrb[6].mxu0  ;;  %v318_v54 = vadd.f32 %v317_v49, %v264_v47 }
 0x2ad   :  { %v329_v52 = vadd.f32 %v764_v50, %v264_v47  ;;  %v320_v53 = vpop.f32.mrb[7].mxu0 }
 0x2ae   :  { %v321_v55 = vadd.f32 %v320_v53, %v264_v47 }
 0x2af   :  { %v333_v56 = vpack.c.bf16 %v329_v52, %v326_v51 }
 0x2b0   :  { %v332_v57 = vpack.c.bf16 %v321_v55, %v318_v54 }
 0x2b2   :  { %769 = vmatprep.mubr.msk.bf16.mxu0 %vm56_vm0, %v332_v57 }
 0x2b3   :  { %770 = vmatmul.mubr.msk.bf16.vlgmr.msra.gmra.mrb[8].mxu0 %vm56_vm0, %v333_v56 }
 0x2b4   :  { %793 = vmatprep.mubr.msk.bf16.mxu0 %vm857_vm1, %v856_v10 }
 0x386   :  { %v771_v61 = vpop.f32.mrb[8].mxu0 }
 0x387   :  { %v401_v62 = vpop.f32.mrb[9].mxu0  ;;  %v410_v0 = vadd.f32 %v771_v61, %v348_v60 }
 0x388   :  { %v772_v63 = vpop.f32.mrb[10].mxu0  ;;  %v402_v3 = vadd.f32 %v401_v62, %v348_v60 }
 0x389   :  { %v413_v1 = vadd.f32 %v772_v63, %v348_v60  ;;  %v404_v2 = vpop.f32.mrb[11].mxu0 }
 0x38a   :  { %v405_v4 = vadd.f32 %v404_v2, %v348_v60 }
 0x38b   :  { %v417_v5 = vpack.c.bf16 %v413_v1, %v410_v0 }
 0x38c   :  { %v416_v6 = vpack.c.bf16 %v405_v4, %v402_v3 }
 0x38e   :  { %773 = vmatprep.subr.bf16.mxu1 %v416_v6 }
 0x38f   :  { %774 = vmatpush3.bf16.msra.mxu1 %v416_v6 }
 0x390   :  { %775 = vmatprep.subr.bf16.mxu1 %v417_v5 }
 0x393   :  { %776 = vmatpush3.bf16.msra.mxu1 %v417_v5 }
 0x394   :  { %781 = vmatprep.subr.bf16.mxu1 %v828_v7 }
 0x396   :  { %778 = vmatmul.mubr.msk.bf16.vlgmr.msra.gmra.mrb[4].mxu1 %vm56_vm0, %v899_v22 }
 0x397   :  { %782 = vmatpush3.bf16.msra.mxu1 %v828_v7  ;;  %785 = vmatprep.mubr.msk.bf16.mxu1 %vm56_vm0, %v332_v57 }
 0x398   :  { %783 = vmatprep.subr.bf16.mxu1 %v829_v8 }
 0x39b   :  { %784 = vmatpush3.bf16.msra.mxu1 %v829_v8 }
 0x3a2   :  { %786 = vmatmul.mubr.msk.bf16.vlgmr.msra.gmra.mrb[4].mxu1 %vm56_vm0, %v333_v56 }
 0x475   :  { %v787_v14 = vpop.f32.mrb[4].mxu1 }
 0x476   :  { %v535_v15 = vadd.f32 %v787_v14, %v532_v13  ;;  %v513_v16 = vpop.f32.mrb[5].mxu1 }
 0x477   :  { %v533_v17 = vadd.f32 %v532_v13, %v513_v16  ;;  %v788_v18 = vpop.f32.mrb[6].mxu1 }
 0x478   :  { %v536_v19 = vadd.f32 %v788_v18, %v532_v13  ;;  %v516_v20 = vpop.f32.mrb[7].mxu1  ;;  %v539_v22 = vmax.f32 %v535_v15, 0.0 }
 0x479   :  { %v534_v21 = vadd.f32 %v532_v13, %v516_v20  ;;  %v537_v24 = vmax.f32 %v533_v17, 0.0 }
 0x47a   :  { %v540_v23 = vmax.f32 %v536_v19, 0.0 }
 0x47b   :  { %v538_v25 = vmax.f32 %v534_v21, 0.0 }
 0x47c   :  { %v547_v26 = vpack.c.bf16 %v540_v23, %v539_v22 }
 0x47d   :  { %v546_v27 = vpack.c.bf16 %v538_v25, %v537_v24 }
 0x47f   :  { %790 = vmatpush3.bf16.msra.mxu0 %v546_v27 }
 0x480   :  { %791 = vmatprep.subr.bf16.mxu0 %v856_v10 }
 0x483   :  { %792 = vmatpush3.bf16.msra.mxu0 %v547_v26 }
 0x484   :  { %797 = vmatprep.subr.bf16.mxu0 %v856_v10 }
 0x486   :  { %794 = vmatmul.mubr.msk.bf16.vlgmr.msra.gmra.mrb[12].mxu0 %vm56_vm0, %v18_v28 }
 0x487   :  { %798 = vmatpush3.bf16.msra.mxu0 %v830_v29  ;;  %801 = vmatprep.mubr.msk.bf16.mxu0 %vm857_vm1, %v856_v10 }
 0x488   :  { %799 = vmatprep.subr.bf16.mxu0 %v856_v10 }
 0x48b   :  { %800 = vmatpush3.bf16.msra.mxu0 %v831_v30 }
 0x559   :  { %v585_v31 = vpop.f32.mrb[12].mxu0 }
 0x55a   :  { %v591_v32 = vpack.c.bf16 %v585_v31, %v585_v31  ;;  %v795_v33 = vpop.f32.mrb[13].mxu0 }
 0x55b   :  { %v588_v34 = vpop.f32.mrb[14].mxu0 }
 0x55c   :  { %v796_v35 = vpop.f32.mrb[15].mxu0  ;;  %802 = vmatmul.mubr.msk.bf16.vlgmr.msra.gmra.mrb[16].mxu0 %vm56_vm0, %v591_v32 }
 0x62f   :  { %v646_v39 = vpop.f32.mrb[16].mxu0 }
 0x630   :  { %v647_v40 = vadd.f32 %v646_v39, %v596_v38  ;;  %v803_v41 = vpop.f32.mrb[17].mxu0 }
 0x631   :  { %v649_v42 = vpop.f32.mrb[18].mxu0 }
 0x632   :  { %652 = vst.msk [vmem:[#allocation2] sm:$0xff] %vm56_vm0, %v647_v40  ;;  %v804_v43 = vpop.f32.mrb[19].mxu0 }
 0x633   :  { %843 = shalt.err (!%p840_p4)
}
 0x634   :  { %s844_s27 = scalar_lea.hbm %s982_s1, 128 }
 0x635   :  { %p845_p5 = scmp.ne.s32.totalorder %s982_s1, %s844_s27  ;;  %p848_p6 = scmp.lt.u32.totalorder %s844_s27, %s982_s1 }
 0x637   :  { %p850_p7 = pnand %p848_p6, %p845_p5 }
 0x639   :  { %853 = shalt.err (!%p850_p7)
}
 0x63a   :  { %662 = dma.vmem_to_hbm [thread:$0]  %s660_s24, 128, %s982_s1, [#allocation3]  }
 0x63b   :  { %854 = dma.done.wait [#allocation3], 128  }
 0x63c   :  { %855 = vsyncadd [#allocation3], 4294967168 }
 0x63d   :  { %666 = vsyncpa [#allocation3], 1 }

</bundles_post_ra>
